<compile_context>
chip_gen: v7x
topology: tpu7x:2x2x1
jax: 0.10.0
libtpu: 0.0.40
codegen_flags: <defaults>
</compile_context>

<pallas_src>
import math
from functools import partial

import jax
import jax.numpy as jnp
from jax.experimental import pallas as pl
from jax.experimental.pallas import tpu as pltpu

_LOG2E = 1.4426950408889634


# --------------------------------------------------------------------------- #
# Kernel bodies
# --------------------------------------------------------------------------- #
def _sdpa_body(q_ref, k_ref, v_ref, out_ref, attn_ref, mask_ref, *,
               scale, use_newton):
    # q_ref: (G, TQ, Dk)   k_ref: (G, S, Dk)   v_ref: (G, S, Dv)
    # out_ref: (G, TQ, Dv) attn_ref: (G, TQ, S)
    # scale = log2(e)/sqrt(d_k) folded into q (scales T*Dk elems, not T*S).
    q = q_ref[...] * jnp.asarray(scale, q_ref.dtype)
    k = k_ref[...]
    v = v_ref[...]

    # QK^T as an NT contraction over the last dim (no materialized k.T),
    # operands in the input dtype, f32 MXU accumulator.
    scores = jnp.einsum("gtd,gsd->gts", q, k,
                        preferred_element_type=jnp.float32)   # (G, TQ, S) f32
    # scores == log2(e) * (q . k) / sqrt(d_k), so exp2 below == true softmax.

    if mask_ref is not None:
        scores = jnp.where(mask_ref[...] != 0, -jnp.inf, scores)

    # Numerically-stable softmax along src_len, using exp2 (log2e pre-folded).
    m = jnp.max(scores, axis=-1, keepdims=True)
    e = jnp.exp2(scores - m)
    denom = jnp.sum(e, axis=-1, keepdims=True)                 # (G, TQ, 1) f32
    inv = pl.reciprocal(denom, approx=True)                    # EUP vrcp slot
    if use_newton:
        inv = inv * (2.0 - denom * inv)                        # ~f32-exact

    # Materialize the probabilities ONCE, already in the attn-output dtype,
    # and reuse them for both the writeback and the P @ V matmul.
    p = (e * inv).astype(attn_ref.dtype)
    attn_ref[...] = p

    p_mm = p if p.dtype == v.dtype else p.astype(v.dtype)
    out = jnp.einsum("gts,gsd->gtd", p_mm, v,
                     preferred_element_type=jnp.float32)       # (G, TQ, Dv)
    out_ref[...] = out.astype(out_ref.dtype)


def _plain_kernel(q_ref, k_ref, v_ref, out_ref, attn_ref, *, scale, use_newton):
    _sdpa_body(q_ref, k_ref, v_ref, out_ref, attn_ref, None,
               scale=scale, use_newton=use_newton)


def _masked_kernel(mask_ref, q_ref, k_ref, v_ref, out_ref, attn_ref, *,
                   scale, use_newton):
    _sdpa_body(q_ref, k_ref, v_ref, out_ref, attn_ref, mask_ref,
               scale=scale, use_newton=use_newton)


# --------------------------------------------------------------------------- #
# Tiling / VMEM heuristics (chip- and shape-aware)
# --------------------------------------------------------------------------- #
def _vmem_capacity_bytes():
    try:
        info = pltpu.get_tpu_info()
        cap = getattr(info, "vmem_capacity_bytes", None)
        if cap:
            return int(cap)
    except Exception:
        pass
    return 64 * 1024 * 1024   # conservative default (v7x-sized)


def _footprint_bytes(G, TQ, S, Dk, Dv, in_bytes, attn_bytes, masked, mask_bytes):
    # Double-buffered pipelined blocks + in-kernel f32 intermediates.
    buf = 2 * G * (TQ * Dk + S * Dk + S * Dv + TQ * Dv) * in_bytes
    buf += 2 * G * TQ * S * attn_bytes          # attn output blocks
    if masked:
        buf += 2 * G * TQ * S * mask_bytes      # mask input blocks
    buf += 3 * G * TQ * S * 4                    # scores / e / p live temps
    buf += G * TQ * Dv * 4                       # f32 matmul accumulator
    return buf


def _choose_config(BH, T, S, Dk, Dv, in_bytes, attn_bytes, masked, mask_bytes,
                   vmem_cap):
    budget = max(int(vmem_cap * 0.75), 8 << 20)

    def fp(g, tq):
        return _footprint_bytes(g, tq, S, Dk, Dv, in_bytes, attn_bytes,
                                masked, mask_bytes)

    # Query tile: the largest candidate (full T when small, else a 128-multiple
    # divisor of T) whose double-buffered footprint fits the VMEM budget.
    cands = []
    if T <= 512:
        cands.append(T)
    cands += [c for c in (512, 256, 128) if c < T and T % c == 0]
    cands = sorted(set(cands), reverse=True)
    if not cands:
        cands = [T]     # ragged T: fall back to the whole query extent

    TQ = cands[-1]
    for c in cands:
        if fp(1, c) <= budget:
            TQ = c
            break

    # Heads per grid step: batch heads whenever the per-step tile is small,
    # to amortize the ~0.35 us per-grid-step overhead (short-S / decode shapes).
    G = 1
    if TQ * S <= 128 * 128 and BH > 1:
        want = max(1, (128 * 128) // max(TQ * S, 1))
        # keep >= 2 head-groups so v7x's megacore split on axis i stays useful
        g_cap = min(want, max(1, BH // 2))
        for g in range(g_cap, 0, -1):
            if BH % g == 0 and fp(g, TQ) <= budget:
                G = g
                break

    needed = fp(G, TQ)
    vmem_limit = max(32 << 20, int(needed * 1.4))
    vmem_limit = min(vmem_limit, int(vmem_cap))
    return G, TQ, vmem_limit


# --------------------------------------------------------------------------- #
# Public wrapper
# --------------------------------------------------------------------------- #
def scaled_dot_product_attention(q_s, k_s, v_s, attn_mask=None, *,
                                 apply_mask=False, attn_dtype=None):
    """q_s: [B, H, T, Dk], k_s: [B, H, S, Dk], v_s: [B, H, S, Dv],
    attn_mask: [B, H, T, S].

    By default the mask is IGNORED, faithfully matching the PyTorch
    reference's non-in-place `masked_fill` bug.  Pass apply_mask=True for the
    (presumably intended) masked softmax.  attn_dtype= overrides the dtype of
    the returned attention matrix (e.g. jnp.bfloat16 to halve its HBM write).

    Returns (attn_value [B, H, T, Dv], attn [B, H, T, S]).
    """
    B, H, T, Dk = q_s.shape
    S = k_s.shape[2]
    Dv = v_s.shape[3]
    BH = B * H

    out_dtype = q_s.dtype
    attn_out_dtype = jnp.dtype(attn_dtype) if attn_dtype is not None \
        else jnp.dtype(q_s.dtype)

    qf = q_s.reshape(BH, T, Dk)
    kf = k_s.reshape(BH, S, Dk)
    vf = v_s.reshape(BH, S, Dv)

    masked = bool(apply_mask and attn_mask is not None)
    mask_f = None
    mask_bytes = 0
    if masked:
        mask_f = attn_mask.reshape(BH, T, S).astype(jnp.int32)
        mask_bytes = 4

    in_bytes = jnp.dtype(q_s.dtype).itemsize
    attn_bytes = attn_out_dtype.itemsize
    vmem_cap = _vmem_capacity_bytes()
    G, TQ, vmem_limit = _choose_config(BH, T, S, Dk, Dv, in_bytes, attn_bytes,
                                       masked, mask_bytes, vmem_cap)

    grid = (BH // G, T // TQ)
    # Fold both 1/sqrt(d_k) and log2(e) into q; the kernel uses exp2 directly.
    scale = _LOG2E / math.sqrt(Dk)
    use_newton = (attn_out_dtype == jnp.dtype(jnp.float32)) or \
                 (jnp.dtype(out_dtype) == jnp.dtype(jnp.float32))

    q_spec = pl.BlockSpec((G, TQ, Dk), lambda i, j: (i, j, 0))
    k_spec = pl.BlockSpec((G, S, Dk), lambda i, j: (i, 0, 0))
    v_spec = pl.BlockSpec((G, S, Dv), lambda i, j: (i, 0, 0))
    out_spec = pl.BlockSpec((G, TQ, Dv), lambda i, j: (i, j, 0))
    attn_spec = pl.BlockSpec((G, TQ, S), lambda i, j: (i, j, 0))

    if masked:
        kernel = partial(_masked_kernel, scale=scale, use_newton=use_newton)
        in_specs = [pl.BlockSpec((G, TQ, S), lambda i, j: (i, j, 0)),
                    q_spec, k_spec, v_spec]
        args = (mask_f, qf, kf, vf)
    else:
        kernel = partial(_plain_kernel, scale=scale, use_newton=use_newton)
        in_specs = [q_spec, k_spec, v_spec]
        args = (qf, kf, vf)

    out_flat, attn_flat = pl.pallas_call(
        kernel,
        out_shape=(
            jax.ShapeDtypeStruct((BH, T, Dv), out_dtype),
            jax.ShapeDtypeStruct((BH, T, S), attn_out_dtype),
        ),
        grid_spec=pltpu.PrefetchScalarGridSpec(
            num_scalar_prefetch=0,
            grid=grid,
            in_specs=in_specs,
            out_specs=(out_spec, attn_spec),
        ),
        compiler_params=pltpu.CompilerParams(
            # Split the v7x megacore on the head-group axis i (K/V blocks are
            # reused across j); splitting on j would duplicate K/V DMAs.
            dimension_semantics=("parallel", "arbitrary"),
            vmem_limit_bytes=vmem_limit,
        ),
    )(*args)

    return (out_flat.reshape(B, H, T, Dv),
            attn_flat.reshape(B, H, T, S))


# --------------------------------------------------------------------------- #
# Self-test
# --------------------------------------------------------------------------- #
if __name__ == "__main__":
    B, H, T, S, Dk, Dv = 2, 4, 8, 8, 32, 32
    key = jax.random.PRNGKey(0)
    kq, kk, kv, km = jax.random.split(key, 4)
    q_s = jax.random.normal(kq, (B, H, T, Dk), dtype=jnp.float32)
    k_s = jax.random.normal(kk, (B, H, S, Dk), dtype=jnp.float32)
    v_s = jax.random.normal(kv, (B, H, S, Dv), dtype=jnp.float32)
    attn_mask = jax.random.bernoulli(km, 0.2, (B, H, T, S))

    # --- default path: mask ignored, exactly like the PyTorch reference ------
    attn_value, attn = scaled_dot_product_attention(q_s, k_s, v_s, attn_mask)
    jax.block_until_ready((attn_value, attn))

    scores_ref = jnp.einsum("bhtd,bhsd->bhts", q_s, k_s) / math.sqrt(Dk)
    attn_ref = jax.nn.softmax(scores_ref, axis=-1)
    out_ref = jnp.einsum("bhts,bhsd->bhtd", attn_ref, v_s)
    assert jnp.allclose(attn, attn_ref, atol=1e-4, rtol=1e-4)
    assert jnp.allclose(attn_value, out_ref, atol=1e-4, rtol=1e-4)

    # --- optional masked path (ensure no fully-masked rows for finiteness) ---
    mask_safe = attn_mask.at[..., 0].set(False)
    mv, ma = scaled_dot_product_attention(q_s, k_s, v_s, mask_safe,
                                          apply_mask=True)
    jax.block_until_ready((mv, ma))
    scores_m = jnp.where(mask_safe, -jnp.inf, scores_ref)
    attn_m = jax.nn.softmax(scores_m, axis=-1)
    out_m = jnp.einsum("bhts,bhsd->bhtd", attn_m, v_s)
    assert jnp.allclose(ma, attn_m, atol=1e-4, rtol=1e-4)
    assert jnp.allclose(mv, out_m, atol=1e-4, rtol=1e-4)

    # --- bf16 smoke test (exercises the no-Newton / bf16-store path) ---------
    qb, kb, vb = (x.astype(jnp.bfloat16) for x in (q_s, k_s, v_s))
    bv, ba = scaled_dot_product_attention(qb, kb, vb, attn_mask)
    jax.block_until_ready((bv, ba))
    assert jnp.allclose(ba.astype(jnp.float32), attn_ref, atol=5e-2, rtol=5e-2)
    assert jnp.allclose(bv.astype(jnp.float32), out_ref, atol=1.5e-1, rtol=5e-2)

    print("KERNEL_OK")
</pallas_src>

<mosaic_0001>
module attributes {stable_mosaic.version = 11 : i64} {
  func.func @_plain_kernel(%arg0: i32, %arg1: i32, %arg2: memref<4x8x32xf32, #tpu.memory_space<vmem>>, %arg3: memref<4x8x32xf32, #tpu.memory_space<vmem>>, %arg4: memref<4x8x32xf32, #tpu.memory_space<vmem>>, %arg5: memref<4x8x32xf32, #tpu.memory_space<vmem>>, %arg6: memref<4x8x8xf32, #tpu.memory_space<vmem>>) attributes {dimension_semantics = [#tpu.dimension_semantics<parallel>, #tpu.dimension_semantics<arbitrary>], iteration_bounds = array<i64: 2, 1>, scalar_prefetch = 0 : i64, scratch_operands = 0 : i64, tpu.core_type = #tpu.core_type<tc>, window_params = [{transform_indices = @transform_0, window_bounds = array<i64: 4, 8, 32>}, {transform_indices = @transform_1, window_bounds = array<i64: 4, 8, 32>}, {transform_indices = @transform_2, window_bounds = array<i64: 4, 8, 32>}, {transform_indices = @transform_3, window_bounds = array<i64: 4, 8, 32>}, {transform_indices = @transform_4, window_bounds = array<i64: 4, 8, 8>}]} {
    %c0 = arith.constant 0 : index
    %c0_0 = arith.constant 0 : index
    %c0_1 = arith.constant 0 : index
    %0 = vector.load %arg2[%c0, %c0_0, %c0_1] : memref<4x8x32xf32, #tpu.memory_space<vmem>>, vector<4x8x32xf32>
    %cst = arith.constant 0.255034864 : f32
    %1 = vector.broadcast %cst : f32 to vector<4x8x32xf32>
    %2 = arith.mulf %0, %1 : vector<4x8x32xf32>
    %c0_2 = arith.constant 0 : index
    %c0_3 = arith.constant 0 : index
    %c0_4 = arith.constant 0 : index
    %3 = vector.load %arg3[%c0_2, %c0_3, %c0_4] : memref<4x8x32xf32, #tpu.memory_space<vmem>>, vector<4x8x32xf32>
    %c0_5 = arith.constant 0 : index
    %c0_6 = arith.constant 0 : index
    %c0_7 = arith.constant 0 : index
    %4 = vector.load %arg4[%c0_5, %c0_6, %c0_7] : memref<4x8x32xf32, #tpu.memory_space<vmem>>, vector<4x8x32xf32>
    "tpu.trace_start"() <{level = 10 : i32, message = "gtd,gsd->gts"}> : () -> ()
    %cst_8 = arith.constant dense<0.000000e+00> : vector<4x8x8xf32>
    %5 = tpu.matmul %2, %3, %cst_8 {dimension_numbers = #tpu.dot_dimension_numbers<[2], [2], [1], [1], [0, 0, 0, 1, 1, 1], [0], [0]>} : vector<4x8x32xf32>, vector<4x8x32xf32>, vector<4x8x8xf32> -> vector<4x8x8xf32>
    "tpu.trace_stop"() : () -> ()
    %cst_9 = arith.constant dense<0xFF800000> : vector<4x8xf32>
    %6 = vector.multi_reduction <maximumf>, %5, %cst_9 [2] : vector<4x8x8xf32> to vector<4x8xf32>
    %7 = vector.shape_cast %6 : vector<4x8xf32> to vector<4x8x1xf32>
    %8 = vector.broadcast %7 : vector<4x8x1xf32> to vector<4x8x8xf32>
    %9 = arith.subf %5, %8 : vector<4x8x8xf32>
    %10 = math.exp2 %9 : vector<4x8x8xf32>
    %cst_10 = arith.constant dense<0.000000e+00> : vector<4x8xf32>
    %11 = vector.multi_reduction <add>, %10, %cst_10 [2] : vector<4x8x8xf32> to vector<4x8xf32>
    %12 = vector.shape_cast %11 : vector<4x8xf32> to vector<4x8x1xf32>
    %13 = tpu.reciprocal %12 {approx = true} : vector<4x8x1xf32> -> vector<4x8x1xf32>
    %14 = arith.mulf %12, %13 : vector<4x8x1xf32>
    %cst_11 = arith.constant 2.000000e+00 : f32
    %15 = vector.broadcast %cst_11 : f32 to vector<4x8x1xf32>
    %16 = arith.subf %15, %14 : vector<4x8x1xf32>
    %17 = arith.mulf %13, %16 : vector<4x8x1xf32>
    %18 = vector.broadcast %17 : vector<4x8x1xf32> to vector<4x8x8xf32>
    %19 = arith.mulf %10, %18 : vector<4x8x8xf32>
    %c0_12 = arith.constant 0 : index
    %c0_13 = arith.constant 0 : index
    %c0_14 = arith.constant 0 : index
    %20 = vector.load %arg6[%c0_12, %c0_13, %c0_14] : memref<4x8x8xf32, #tpu.memory_space<vmem>>, vector<4x8x8xf32>
    tpu.vector_store %arg6[%c0_12, %c0_13, %c0_14], %19 {strides = array<i32>} : memref<4x8x8xf32, #tpu.memory_space<vmem>>, vector<4x8x8xf32>,
    "tpu.trace_start"() <{level = 10 : i32, message = "gts,gsd->gtd"}> : () -> ()
    %cst_15 = arith.constant dense<0.000000e+00> : vector<4x8x32xf32>
    %21 = tpu.matmul %19, %4, %cst_15 {dimension_numbers = #tpu.dot_dimension_numbers<[2], [1], [1], [2], [0, 0, 0, 1, 1, 2], [0], [0]>} : vector<4x8x8xf32>, vector<4x8x32xf32>, vector<4x8x32xf32> -> vector<4x8x32xf32>
    "tpu.trace_stop"() : () -> ()
    %c0_16 = arith.constant 0 : index
    %c0_17 = arith.constant 0 : index
    %c0_18 = arith.constant 0 : index
    %22 = vector.load %arg5[%c0_16, %c0_17, %c0_18] : memref<4x8x32xf32, #tpu.memory_space<vmem>>, vector<4x8x32xf32>
    tpu.vector_store %arg5[%c0_16, %c0_17, %c0_18], %21 {strides = array<i32>} : memref<4x8x32xf32, #tpu.memory_space<vmem>>, vector<4x8x32xf32>,
    return
  }
  func.func @transform_0(%arg0: i32, %arg1: i32) -> (i32, i32, i32) {
    %c0_i32 = arith.constant 0 : i32
    %c0_i32_0 = arith.constant 0 : i32
    return %arg0, %arg1, %c0_i32 : i32, i32, i32
  }
  func.func @transform_1(%arg0: i32, %arg1: i32) -> (i32, i32, i32) {
    %c0_i32 = arith.constant 0 : i32
    %c0_i32_0 = arith.constant 0 : i32
    %c0_i32_1 = arith.constant 0 : i32
    return %arg0, %c0_i32, %c0_i32_0 : i32, i32, i32
  }
  func.func @transform_2(%arg0: i32, %arg1: i32) -> (i32, i32, i32) {
    %c0_i32 = arith.constant 0 : i32
    %c0_i32_0 = arith.constant 0 : i32
    %c0_i32_1 = arith.constant 0 : i32
    return %arg0, %c0_i32, %c0_i32_0 : i32, i32, i32
  }
  func.func @transform_3(%arg0: i32, %arg1: i32) -> (i32, i32, i32) {
    %c0_i32 = arith.constant 0 : i32
    %c0_i32_0 = arith.constant 0 : i32
    return %arg0, %arg1, %c0_i32 : i32, i32, i32
  }
  func.func @transform_4(%arg0: i32, %arg1: i32) -> (i32, i32, i32) {
    %c0_i32 = arith.constant 0 : i32
    %c0_i32_0 = arith.constant 0 : i32
    return %arg0, %arg1, %c0_i32 : i32, i32, i32
  }
}

</mosaic_0001>

<bundles_post_ra>
// kernel: tpu_custom_call.1
= control target key start
LH: loop header
LB: loop body
LE: loop exit
PB: predicated region body
PF: predicated region fallthrough
CT: control target
= control target key end

     0   :  { %s2030_s0 = inlined_call_operand.hbm [shape: f32[8,8,32], index: 0, kind: input, shape index: {}]   ;;  %s2031_s1 = inlined_call_operand.hbm [shape: f32[8,8,32], index: 1, kind: input, shape index: {}]   ;;  %s2032_s2 = inlined_call_operand.hbm [shape: f32[8,8,32], index: 2, kind: input, shape index: {}]   ;;  %s2033_s3 = inlined_call_operand.hbm [shape: f32[8,8,32], index: 3, kind: output, shape index: {0}]   ;;  %s2034_s4 = inlined_call_operand.hbm [shape: f32[8,8,8], index: 4, kind: output, shape index: {1}]  }
   0x1   :  { %2046 = sst [smem:[#allocation19_spill]] %s2031_s1 }
   0x2   :  { %10 = vsyncpa [#allocation3], 0 }
   0x3   :  { %12 = vsyncpa [#allocation3 + $0x1], 0 }
   0x4   :  { %13 = vsyncpa [#allocation6], 0 }
   0x5   :  { %15 = vsyncpa [#allocation6 + $0x1], 0 }
   0x6   :  { %16 = vsyncpa [#allocation4], 0 }
   0x7   :  { %18 = vsyncpa [#allocation4 + $0x1], 0 }
   0x8   :  { %19 = vsyncpa [#allocation10], 0 }
   0x9   :  { %21 = vsyncpa [#allocation10 + $0x1], 0  ;;  %s1646_s15 = smov 0   ;;  %s1648_s16 = smov 0  }
   0xa   :  { %s1650_s17 = smov 0   ;;  %s1652_s18 = smov 0  }
   0xb   :  { %s1654_s19 = smov 0   ;;  %s1656_s20 = smov 0  }
   0xc LB: > { %2047 = sst [smem:[#allocation15_spill]] %s1604_s19  ;;  %s1677_s21 = sadd.s32 4294967295, %s1608_s20   ;;  %s1608_s20 = sphi %s1656_s20, %s27_s20   ;;  %s1604_s19 = sphi %s1654_s19, %s2072_s19   ;;  %s1600_s18 = sphi %s1652_s18, %s2071_s18   ;;  %s1596_s17 = sphi %s1650_s17, %s2075_s17   ;;  %s1592_s16 = sphi %s1648_s16, %s2074_s16   ;;  %s1588_s15 = sphi %s1646_s15, %s2073_s15  }
   0xd   : > { %2048 = sst [smem:[#allocation16_spill]] %s1608_s20  ;;  %s1202_s22 = sadd.s32 4294967294, %s1608_s20  }
   0xe   : > { %s39_s23 = sadd.s32 1, %s1604_s19  ;;  %s48_s24 = sadd.s32 1, %s1596_s17 }
   0xf   : > { %p41_p0 = scmp.ge.s32.totalorder %s39_s23, 2  ;;  %p55_p1 = scmp.ne.s32.totalorder %s1596_s17, %s1592_s16 }
  0x10   : > { %p56_p2 = scmp.eq.s32.totalorder %s1608_s20, 0  ;;  %p61_p3 = scmp.ne.s32.totalorder %s1592_s16, %s1588_s15 }
  0x11   : > { %s2077_s23 = smov (%p41_p0, %s39_s23), 0  ;;  %p62_p5 = scmp.eq.s32.totalorder %s1677_s21, 0 }
  0x12   : > { %2049 = sst [smem:[#allocation17_spill]] %s2077_s23  ;;  %p1689_p4 = por %p56_p2, %p55_p1 }
  0x13   : > { %s43_s26 = ssub.s32 %s1604_s19, %s2077_s23  ;;  %p139_p6 = scmp.eq.s32.totalorder %s1677_s21, 1 }
  0x14   : > { %p46_p7 = scmp.eq.s32.totalorder %s43_s26, 0  ;;  %p1697_p8 = por %p62_p5, %p61_p3 }
  0x15   : > { %p1701_p9 = por %p139_p6, %p55_p1  ;;  %p145_p10 = scmp.eq.s32.totalorder %s1202_s22, 1 }
  0x16   : > { %s2051_s27 = scalar_select %p1697_p8, 1, 0 }
  0x17   : > { %s2052_s28 = scalar_select %p1701_p9, 1, 0 }
  0x18   : > { %s1706_s29 = scalar_select %p46_p7, %s1596_s17, %s48_s24  }
  0x19   : > { %p1708_p11 = por %p145_p10, %p61_p3  ;;  %p1328_p13 = scmp.lt.s32.totalorder %s1608_s20, 2 }
  0x1a   : > { %2053 = sst [smem:[#allocation18_spill]] %s1706_s29  ;;  %s2035_s5 = sand.u32 1, %s1596_s17  }
  0x1b   : > { %s2054_s30 = scalar_select %p1708_p11, 1, 0 }
  0x1c   : > { %s1717_s6 = sshll.u32 %s2035_s5, 5  ;;  %s1720_s7 = sshll.u32 %s1604_s19, 9 }
  0x1d   : > { %p1724_p0 = pnand %p1328_p13, %p1689_p4  ;;  %s215_s9 = sand.u32 1, %s1608_s20  }
  0x1e   : > { %s2056_s1 = sld [smem:[#allocation19_spill]]  ;;  %s219_s13 = scalar_lea.vmem [#allocation5], %s1717_s6 }
  0x1f   : > { %s226_s14 = sshll.u32 %s219_s13, 4  ;;  %s1740_s22 = scalar_lea.sflag [#allocation6], %s215_s9  ;;  %s1737_s14 = int_to_ptr.vmem [resolvable:$true] %s226_s14 }
  0x20   : > { %p1746_p4 = pneg %p1724_p0 }
  0x24   : > { %s1733_s12 = scalar_lea.hbm %s2056_s1, %s1720_s7  ;;  %s1405_s11 = scalar_lea.hbm %s2056_s1, 1024 }
  0x25   : > { %s1400_s24 = scalar_lea.hbm %s1733_s12, 512  ;;  %p1406_p7 = scmp.lt.u32.totalorder %s1733_s12, %s2056_s1 }
  0x26   : > { %p1401_p3 = scmp.ne.s32.totalorder %s1733_s12, %s1400_s24  ;;  %p1407_p10 = scmp.lt.u32.totalorder %s1405_s11, %s1400_s24 }
  0x27   : > { %p1409_p12 = scmp.lt.u32.totalorder %s1400_s24, %s1733_s12 }
  0x28   : > { %p1403_p5 = pnand %p1746_p4, %p1401_p3  ;;  %p1408_p13 = por %p1407_p10, %p1406_p7 }
  0x2a   : > { %p1404_p6 = pneg %p1403_p5  ;;  %p1410_p1 = por %p1409_p12, %p1408_p13 }
  0x2c   : > { %p1411_p2 = pnand %p1410_p1, %p1404_p6 }
  0x2e   : > { %1414 = shalt.err (!%p1411_p2)
}
  0x2f   : > { %s1415_s9 = scalar_lea.vmem %s1737_s14, 512  ;;  %s1610_s26 = smov [#allocation5]  }
  0x30   : > { %p1416_p3 = scmp.ne.s32.totalorder %s1737_s14, %s1415_s9  ;;  %s1420_s10 = sshll.u32 %s1610_s26, 4  ;;  %s1421_s10 = int_to_ptr.vmem [resolvable:$false] %s1420_s10 }
  0x31   : > { %s1422_s5 = scalar_lea.vmem %s1421_s10, 1024  ;;  %p1423_p9 = scmp.lt.s32.totalorder %s1737_s14, %s1421_s10 }
  0x32   : > { %p1418_p5 = pnand %p1416_p3, %p1746_p4  ;;  %p1424_p8 = scmp.lt.s32.totalorder %s1422_s5, %s1415_s9 }
  0x34   : > { %p1419_p11 = pneg %p1418_p5  ;;  %p1425_p7 = por %p1424_p8, %p1423_p9 }
  0x36   : > { %p1426_p10 = pnand %p1425_p7, %p1419_p11 }
  0x38   : > { %1429 = shalt.err (!%p1426_p10)
}
  0x39   : > { %s2038_s24 = smov 128   ;;  %s2040_s11 = smov 8  }
  0x3a   : > { %1317 = dma.hbm_to_vmem [thread:$0]  (!%p1724_p0), %s1733_s12, 512, %s1737_s14, %s1740_s22, %s2038_s24, %s2038_s24, %s2040_s11  }
  0x3b   : > { %p2058_p8 = scmp.lt.s32.totalorder %s1608_s20, 3  ;;  %p2059_p9 = scmp.ge.s32.totalorder %s1608_s20, 1 }
  0x3c   : > { %s1785_s10 = scalar_lea.hbm %s2030_s0, %s1720_s7  ;;  %s197_s5 = scalar_lea.vmem [#allocation2], %s1717_s6 }
  0x3d   : > { %p1777_p11 = pnand %p2059_p9, %p2058_p8  ;;  %s205_s1 = sshll.u32 %s197_s5, 4  ;;  %s1788_s1 = int_to_ptr.vmem [resolvable:$true] %s205_s1 }
  0x3e   : > { %s1794_s24 = scalar_lea.hbm %s2032_s2, %s1720_s7  ;;  %s2061_s11 = sand.u32 1, %s1596_s17  }
  0x3f   : > { %s2060_s13 = scalar_select %p1777_p11, 1, 0 }
  0x40   : > { %s1798_s23 = scalar_lea.sflag [#allocation3], %s2061_s11  ;;  %s1430_s19 = scalar_lea.hbm %s1785_s10, 512 }
  0x41   : > { %p1431_p12 = scmp.ne.s32.totalorder %s1785_s10, %s1430_s19  ;;  %s1435_s29 = scalar_lea.hbm %s2030_s0, 1024 }
  0x42   : > { %p1436_p6 = scmp.lt.u32.totalorder %s1785_s10, %s2030_s0  ;;  %p1437_p13 = scmp.lt.u32.totalorder %s1435_s29, %s1430_s19 }
  0x43   : > { %p1433_p1 = pnand %p1431_p12, %p1746_p4  ;;  %p1439_p5 = scmp.lt.u32.totalorder %s1430_s19, %s1785_s10 }
  0x44   : > { %p1438_p3 = por %p1437_p13, %p1436_p6 }
  0x45   : > { %p1434_p2 = pneg %p1433_p1 }
  0x46   : > { %p1440_p7 = por %p1439_p5, %p1438_p3 }
  0x48   : > { %p1441_p10 = pnand %p1440_p7, %p1434_p2 }
  0x4a   : > { %1444 = shalt.err (!%p1441_p10)
}
  0x4b   : > { %s1445_s7 = scalar_lea.vmem %s1788_s1, 512  ;;  %s1613_s11 = smov [#allocation2]  }
  0x4c   : > { %p1446_p8 = scmp.ne.s32.totalorder %s1788_s1, %s1445_s7  ;;  %s1450_s12 = sshll.u32 %s1613_s11, 4  ;;  %s1451_s12 = int_to_ptr.vmem [resolvable:$false] %s1450_s12 }
  0x4d   : > { %s1452_s20 = scalar_lea.vmem %s1451_s12, 1024  ;;  %p1453_p1 = scmp.lt.s32.totalorder %s1788_s1, %s1451_s12 }
  0x4e   : > { %p1448_p9 = pnand %p1446_p8, %p1746_p4  ;;  %p1454_p11 = scmp.lt.s32.totalorder %s1452_s20, %s1445_s7 }
  0x50   : > { %p1449_p12 = pneg %p1448_p9  ;;  %p1455_p6 = por %p1454_p11, %p1453_p1 }
  0x52   : > { %p1456_p13 = pnand %p1455_p6, %p1449_p12 }
  0x54   : > { %1459 = shalt.err (!%p1456_p13)
}
  0x55   : > { %s2062_s19 = smov 8   ;;  %s2063_s29 = smov 128  }
  0x56   : > { %1314 = dma.hbm_to_vmem [thread:$0]  (!%p1724_p0), %s1785_s10, 512, %s1788_s1, %s1798_s23, %s2063_s29, %s2063_s29, %s2062_s19  }
  0x57   : > { %s240_s14 = scalar_lea.vmem [#allocation7], %s1717_s6  ;;  %s1460_s26 = scalar_lea.hbm %s1794_s24, 512 }
  0x58   : > { %s247_s9 = sshll.u32 %s240_s14, 4  ;;  %p1461_p11 = scmp.ne.s32.totalorder %s1794_s24, %s1460_s26  ;;  %s1826_s9 = int_to_ptr.vmem [resolvable:$true] %s247_s9 }
  0x59   : > { %s1465_s11 = scalar_lea.hbm %s2032_s2, 1024  ;;  %p1466_p5 = scmp.lt.u32.totalorder %s1794_s24, %s2032_s2 }
  0x5a   : > { %p1463_p2 = pnand %p1461_p11, %p1746_p4  ;;  %p1467_p7 = scmp.lt.u32.totalorder %s1465_s11, %s1460_s26 }
  0x5b   : > { %p1469_p8 = scmp.lt.u32.totalorder %s1460_s26, %s1794_s24 }
  0x5c   : > { %p1464_p3 = pneg %p1463_p2  ;;  %p1468_p10 = por %p1467_p7, %p1466_p5 }
  0x5e   : > { %p1470_p9 = por %p1469_p8, %p1468_p10 }
  0x60   : > { %p1471_p12 = pnand %p1470_p9, %p1464_p3 }
  0x62   : > { %1474 = shalt.err (!%p1471_p12)
}
  0x63   : > { %s1475_s1 = scalar_lea.vmem %s1826_s9, 512  ;;  %s1614_s23 = smov [#allocation7]  }
  0x64   : > { %p1476_p1 = scmp.ne.s32.totalorder %s1826_s9, %s1475_s1  ;;  %s1480_s6 = sshll.u32 %s1614_s23, 4  ;;  %s1481_s6 = int_to_ptr.vmem [resolvable:$false] %s1480_s6 }
  0x65   : > { %s1482_s10 = scalar_lea.vmem %s1481_s6, 1024  ;;  %p1483_p11 = scmp.lt.s32.totalorder %s1826_s9, %s1481_s6 }
  0x66   : > { %p1478_p6 = pnand %p1476_p1, %p1746_p4  ;;  %p1484_p2 = scmp.lt.s32.totalorder %s1482_s10, %s1475_s1 }
  0x68   : > { %p1479_p13 = pneg %p1478_p6  ;;  %p1485_p5 = por %p1484_p2, %p1483_p11 }
  0x6a   : > { %p1486_p7 = pnand %p1485_p5, %p1479_p13 }
  0x6c   : > { %1489 = shalt.err (!%p1486_p7)
}
  0x6d   : > { %1320 = dma.hbm_to_vmem [thread:$0]  (!%p1724_p0), %s1794_s24, 512, %s1826_s9, %s1740_s22, %s2063_s29, %s2063_s29, %s2062_s19  }
  0x6e   : > { %p2064_p4 = scmp.ne.s32.totalorder %s2060_s13, 0 }
  0x6f   : > { %s1856_s25 = sand.u32 (!%p2064_p4), 1, %s1592_s16   ;;  %p2065_p3 = scmp.ne.s32.totalorder (!%p2064_p4), %s2051_s27, 0 }
  0x70   : > { %259 = sbr.rel (%p2064_p4) target bundleno = 893 (0x37d), region = 32  ;;  %s1859_s14 = sshll.u32 (!%p2064_p4), %s1856_s25, 5 }
  0x71   : > { %s262_s8 = scalar_lea.sflag (!%p2064_p4), [#allocation3], %s1856_s25  ;;  %s265_s26 = scalar_lea.vmem (!%p2064_p4), [#allocation2], %s1859_s14 }
  0x77   : > { %1571 = dma.done.wait (%p2065_p3), %s262_s8, 512  }
  0x78   : > { %1573 = vsyncadd (%p2065_p3), %s262_s8, 4294966784  ;;  %s270_s22 = sand.u32 1, %s1677_s21   ;;  %s274_s13 = scalar_lea.vmem [#allocation5], %s1859_s14 }
  0x79   : > { %s271_s24 = scalar_lea.sflag [#allocation6], %s270_s22 }
  0x7a   : > { %1575 = dma.done.wait (%p2065_p3), %s271_s24, 1024  }
  0x7b   : > { %1577 = vsyncadd (%p2065_p3), %s271_s24, 4294966272  ;;  %v1615_v0 = vmov 0.0   ;;  %vm1616_vm0 = vmmov 0   ;;  %vm344_vm1 = vcmask 261120   ;;  %v336_v1 = vld [vmem:[%s274_s13] sm:$0xff]  ;;  %v337_v3 = vld [vmem:[%s274_s13 + $0x8] sm:$0xff] }
  0x7c   : > { %1261 = vmatprep.subr.mxu0 %v1615_v0  ;;  %1263 = vmatprep.mubr.msk.f32.mxu0 %vm1616_vm0, %v1615_v0  ;;  %v328_v2 = vld [vmem:[%s265_s26] sm:$0xff]  ;;  %v329_v5 = vld [vmem:[%s265_s26 + $0x8] sm:$0xff]  ;;  %v330_v6 = vld [vmem:[%s265_s26 + $0x10] sm:$0xff]  ;;  %vm649_vm2 = vcmask 64512   ;;  %s1908_s21 = scalar_lea.vmem [#allocation7], %s1859_s14  ;;  %s322_s27 = scalar_lea.vmem [#allocation9], %s1859_s14 }
  0x7d   : > { %1266 = vmatprep.subr.mxu1 %v1615_v0  ;;  %1268 = vmatprep.mubr.msk.f32.mxu1 %vm1616_vm0, %v1615_v0  ;;  %v332_v4 = vmul.f32 0.25503486, %v328_v2  ;;  %v338_v7 = vld [vmem:[%s274_s13 + $0x10] sm:$0xff]  ;;  %v333_v8 = vmul.f32 0.25503486, %v329_v5  ;;  %v331_v9 = vld [vmem:[%s265_s26 + $0x18] sm:$0xff] }
  0x7e   : > { %1262 = vmatpush3.xpose.msk.msra.mxu0 %vm344_vm1, %v336_v1  ;;  %1267 = vmatpush3.xpose.msk.msra.mxu1 %vm344_vm1, %v337_v3  ;;  %v339_v10 = vld [vmem:[%s274_s13 + $0x18] sm:$0xff]  ;;  %v334_v11 = vmul.f32 0.25503486, %v330_v6  ;;  %v335_v12 = vmul.f32 0.25503486, %v331_v9  ;;  %v340_v41 = vld [vmem:[%s1908_s21] sm:$0xff] }
  0x7f   : > { %1271 = vmatprep.subr.mxu0 %v1615_v0  ;;  %1276 = vmatprep.subr.mxu1 %v1615_v0  ;;  %v341_v42 = vld [vmem:[%s1908_s21 + $0x8] sm:$0xff]  ;;  %v342_v57 = vld [vmem:[%s1908_s21 + $0x10] sm:$0xff]  ;;  %v343_v2 = vld [vmem:[%s1908_s21 + $0x18] sm:$0xff]  ;;  %s1243_s19 = sshll.u32 %s1600_s18, 9  ;;  %s1039_s7 = sshll.u32 %s322_s27, 4  ;;  %s1937_s7 = int_to_ptr.vmem [resolvable:$true] %s1039_s7 }
  0x80   : > { %s1935_s5 = scalar_lea.hbm %s2034_s4, %s1243_s19  ;;  %s1008_s11 = scalar_lea.sflag [#allocation10], %s1856_s25 }
  0x81   : > { %1264 = vmatmul.mubr.msk.f32.vlgmr.msra.gmra.mrb[0].mxu0 %vm344_vm1, %v332_v4  ;;  %1269 = vmatmul.mubr.msk.f32.vlgmr.msra.gmra.mrb[0].mxu1 %vm344_vm1, %v333_v8  ;;  %s1490_s12 = scalar_lea.vmem %s1937_s7, 512  ;;  %p2066_p10 = scmp.ne.s32.totalorder %s2052_s28, 0 }
  0x82   : > { %1272 = vmatpush3.xpose.msk.msra.mxu0 %vm344_vm1, %v338_v7  ;;  %1273 = vmatprep.mubr.msk.f32.mxu0 %vm1616_vm0, %v1615_v0  ;;  %p1491_p0 = scmp.ne.s32.totalorder %s1937_s7, %s1490_s12  ;;  %s1617_s20 = smov [#allocation9]  }
  0x83   : > { %1277 = vmatpush3.xpose.msk.msra.mxu1 %vm344_vm1, %v339_v10  ;;  %1278 = vmatprep.mubr.msk.f32.mxu1 %vm1616_vm0, %v1615_v0  ;;  %s1494_s1 = sshll.u32 %s1617_s20, 4  ;;  %s1495_s1 = int_to_ptr.vmem [resolvable:$false] %s1494_s1 }
  0x84   : > { %1281 = vmatprep.subr.mxu0 %v1615_v0  ;;  %1286 = vmatprep.subr.mxu1 %v1615_v0  ;;  %p1492_p8 = pnand %p1491_p0, %p2066_p10  ;;  %s1496_s23 = scalar_lea.vmem %s1495_s1, 1024 }
  0x85   : > { %1274 = vmatmul.mubr.msk.f32.vlgmr.msra.gmra.mrb[2].mxu0 %vm344_vm1, %v334_v11  ;;  %p1497_p12 = scmp.lt.s32.totalorder %s1937_s7, %s1495_s1  ;;  %p1498_p1 = scmp.lt.s32.totalorder %s1496_s23, %s1490_s12 }
  0x86   : > { %1279 = vmatmul.mubr.msk.f32.vlgmr.msra.gmra.mrb[2].mxu1 %vm344_vm1, %v335_v12  ;;  %1283 = vmatprep.mubr.msk.f32.mxu0 %vm1616_vm0, %v1615_v0  ;;  %p1493_p9 = pneg %p1492_p8 }
  0x87   : > { %1288 = vmatprep.mubr.msk.f32.mxu1 %vm1616_vm0, %v1615_v0  ;;  %1282 = vmatpush3.msra.mxu0 %v340_v41  ;;  %p1499_p6 = por %p1498_p1, %p1497_p12 }
  0x88   : > { %1291 = vmatprep.subr.mxu0 %v1615_v0  ;;  %1287 = vmatpush3.msra.mxu1 %v341_v42 }
  0x89   : > { %1296 = vmatprep.subr.mxu1 %v1615_v0  ;;  %p1500_p13 = pnand %p1499_p6, %p1493_p9 }
 0x154   : > { %v417_v13 = vpop.f32.mrb[0].mxu0  ;;  %v493_v14 = vpop.f32.mrb[0].mxu1 }
 0x155   : > { %v1265_v15 = vpop.f32.mrb[1].mxu0  ;;  %v650_v16 = vsel %vm649_vm2, %v417_v13, -inf  ;;  %v1270_v17 = vpop.f32.mrb[1].mxu1  ;;  %v653_v18 = vsel %vm649_vm2, %v493_v14, -inf }
 0x156   : > { %651 = vmax.xlane.f32.xlu0 %v650_v16 }
 0x158   : > { %v569_v19 = vpop.f32.mrb[2].mxu0 }
 0x159   : > { %v1275_v20 = vpop.f32.mrb[3].mxu0  ;;  %v656_v21 = vsel %vm649_vm2, %v569_v19, -inf  ;;  %v645_v22 = vpop.f32.mrb[2].mxu1 }
 0x15a   : > { %654 = vmax.xlane.f32.xlu0 %v653_v18  ;;  %657 = vmax.xlane.f32.xlu1 %v656_v21  ;;  %v1280_v23 = vpop.f32.mrb[3].mxu1  ;;  %v659_v24 = vsel %vm649_vm2, %v645_v22, -inf }
 0x15e   : > { %660 = vmax.xlane.f32.xlu1 %v659_v24 }
 0x1e3   : > { %v652_v25 = vpop.xlane.xlu0 %651 }
 0x1e4   : > { %v662_v26 = vsub.f32 %v417_v13, %v652_v25 }
 0x1e6   : > { %1384 = vpow2.f32 %v662_v26 }
 0x1e7   : > { %v655_v27 = vpop.xlane.xlu0 %654  ;;  %v658_v28 = vpop.xlane.xlu1 %657 }
 0x1e8   : > { %v663_v29 = vsub.f32 %v493_v14, %v655_v27  ;;  %v664_v30 = vsub.f32 %v569_v19, %v658_v28 }
 0x1ea   : > { %1386 = vpow2.f32 %v663_v29 }
 0x1eb   : > { %1388 = vpow2.f32 %v664_v30  ;;  %v661_v31 = vpop.xlane.xlu1 %660 }
 0x1ec   : > { %v665_v32 = vsub.f32 %v645_v22, %v661_v31 }
 0x1ee   : > { %1390 = vpow2.f32 %v665_v32 }
 0x1f0   : > { %v1385_v33 = vpop.eup %1384 }
 0x1f1   : > { %v670_v34 = vsel %vm649_vm2, %v1385_v33, 0.0 }
 0x1f2   : > { %671 = vadd.xlane.f32.xlu0 %v670_v34 }
 0x1f4   : > { %v1387_v35 = vpop.eup %1386 }
 0x1f5   : > { %v1389_v36 = vpop.eup %1388  ;;  %v673_v37 = vsel %vm649_vm2, %v1387_v35, 0.0 }
 0x1f6   : > { %674 = vadd.xlane.f32.xlu1 %v673_v37  ;;  %v676_v38 = vsel %vm649_vm2, %v1389_v36, 0.0 }
 0x1f7   : > { %677 = vadd.xlane.f32.xlu0 %v676_v38 }
 0x1f8   : > { %v1391_v39 = vpop.eup %1390 }
 0x1f9   : > { %v679_v40 = vsel %vm649_vm2, %v1391_v39, 0.0 }
 0x1fa   : > { %680 = vadd.xlane.f32.xlu1 %v679_v40 }
 0x27f   : > { %v672_v43 = vpop.xlane.xlu0 %671 }
 0x280   : > { %1392 = vrcp.f32 %v672_v43 }
 0x283   : > { %v675_v44 = vpop.xlane.xlu1 %674 }
 0x284   : > { %v678_v45 = vpop.xlane.xlu0 %677  ;;  %1394 = vrcp.f32 %v675_v44 }
 0x285   : > { %1396 = vrcp.f32 %v678_v45 }
 0x287   : > { %v681_v46 = vpop.xlane.xlu1 %680 }
 0x288   : > { %1398 = vrcp.f32 %v681_v46 }
 0x28a   : > { %v1393_v47 = vpop.eup %1392 }
 0x28b   : > { %v686_v48 = vmul.f32 %v1393_v47, %v672_v43 }
 0x28d   : > { %v690_v49 = vsub.f32 2.0, %v686_v48 }
 0x28e   : > { %v1395_v50 = vpop.eup %1394 }
 0x28f   : > { %v1397_v51 = vpop.eup %1396  ;;  %v694_v52 = vmul.f32 %v1393_v47, %v690_v49  ;;  %v687_v53 = vmul.f32 %v1395_v50, %v675_v44 }
 0x290   : > { %v688_v54 = vmul.f32 %v1397_v51, %v678_v45 }
 0x291   : > { %v698_v55 = vmul.f32 %v1385_v33, %v694_v52  ;;  %v691_v56 = vsub.f32 2.0, %v687_v53 }
 0x292   : > { %v1399_v58 = vpop.eup %1398  ;;  %v692_v59 = vsub.f32 2.0, %v688_v54 }
 0x293   : > { %702 = vst.msk [vmem:[%s322_s27] sm:$0xff] %vm649_vm2, %v698_v55  ;;  %v695_v60 = vmul.f32 %v1395_v50, %v691_v56  ;;  %v689_v61 = vmul.f32 %v1399_v58, %v681_v46  ;;  %1284 = vmatmul.mubr.msk.f32.vlgmr.msra.gmra.mrb[4].mxu0 %vm649_vm2, %v698_v55 }
 0x294   : > { %v696_v62 = vmul.f32 %v1397_v51, %v692_v59  ;;  %1292 = vmatpush3.msra.mxu0 %v342_v57  ;;  %1293 = vmatprep.mubr.msk.f32.mxu0 %vm1616_vm0, %v1615_v0 }
 0x295   : > { %v699_v63 = vmul.f32 %v1387_v35, %v695_v60  ;;  %v693_v1 = vsub.f32 2.0, %v689_v61 }
 0x296   : > { %v700_v3 = vmul.f32 %v1389_v36, %v696_v62 }
 0x297   : > { %703 = vst.msk [vmem:[%s322_s27 + $0x8] sm:$0xff] %vm649_vm2, %v699_v63  ;;  %v697_v4 = vmul.f32 %v1399_v58, %v693_v1  ;;  %1289 = vmatmul.mubr.msk.f32.vlgmr.msra.gmra.mrb[4].mxu1 %vm649_vm2, %v699_v63 }
 0x298   : > { %704 = vst.msk [vmem:[%s322_s27 + $0x10] sm:$0xff] %vm649_vm2, %v700_v3  ;;  %1294 = vmatmul.mubr.msk.f32.vlgmr.msra.gmra.mrb[6].mxu0 %vm649_vm2, %v700_v3  ;;  %1297 = vmatpush3.msra.mxu1 %v343_v2 }
 0x299   : > { %v701_v5 = vmul.f32 %v1391_v39, %v697_v4  ;;  %1298 = vmatprep.mubr.msk.f32.mxu1 %vm1616_vm0, %v1615_v0 }
 0x29b   : > { %705 = vst.msk [vmem:[%s322_s27 + $0x18] sm:$0xff] %vm649_vm2, %v701_v5  ;;  %1299 = vmatmul.mubr.msk.f32.vlgmr.msra.gmra.mrb[6].mxu1 %vm649_vm2, %v701_v5 }
 0x29c   : > { %1503 = shalt.err (!%p1500_p13)
}
 0x29d   : > { %s1504_s6 = scalar_lea.hbm %s1935_s5, 512  ;;  %s1508_s26 = scalar_lea.hbm %s2034_s4, 1024 }
 0x29e   : > { %p1505_p11 = scmp.ne.s32.totalorder %s1935_s5, %s1504_s6  ;;  %p1509_p7 = scmp.lt.u32.totalorder %s1935_s5, %s2034_s4 }
 0x29f   : > { %p1510_p4 = scmp.lt.u32.totalorder %s1508_s26, %s1504_s6  ;;  %p1512_p0 = scmp.lt.u32.totalorder %s1504_s6, %s1935_s5 }
 0x2a0   : > { %p1506_p2 = pnand %p1505_p11, %p2066_p10 }
 0x2a1   : > { %p1511_p3 = por %p1510_p4, %p1509_p7 }
 0x2a2   : > { %p1507_p5 = pneg %p1506_p2 }
 0x2a3   : > { %p1513_p8 = por %p1512_p0, %p1511_p3 }
 0x2a5   : > { %p1514_p9 = pnand %p1513_p8, %p1507_p5 }
 0x2a7   : > { %1517 = shalt.err (!%p1514_p9)
}
 0x2a8   : > { %s1618_s13 = smov 128   ;;  %s1619_s21 = smov 8  }
 0x2a9   : > { %1308 = dma.vmem_to_hbm [thread:$0]  (%p2066_p10), %s1937_s7, 512, %s1935_s5, %s1008_s11, %s1618_s13, %s1618_s13, %s1619_s21  }
 0x2aa   : > { %s315_s27 = scalar_lea.vmem [#allocation8], %s1859_s14  ;;  %s1977_s5 = scalar_lea.hbm %s2033_s3, %s1243_s19 }
 0x2ab   : > { %s1022_s29 = sshll.u32 %s315_s27, 4  ;;  %s1003_s7 = scalar_lea.sflag [#allocation4], %s1856_s25  ;;  %s1969_s29 = int_to_ptr.vmem [resolvable:$true] %s1022_s29 }
 0x2ac   : > { %s1518_s11 = scalar_lea.vmem %s1969_s29, 512  ;;  %s1620_s12 = smov [#allocation8]  }
 0x2ad   : > { %p1519_p12 = scmp.ne.s32.totalorder %s1969_s29, %s1518_s11  ;;  %s1522_s20 = sshll.u32 %s1620_s12, 4  ;;  %s1523_s20 = int_to_ptr.vmem [resolvable:$false] %s1522_s20 }
 0x2ae   : > { %s1524_s1 = scalar_lea.vmem %s1523_s20, 1024  ;;  %p1525_p13 = scmp.lt.s32.totalorder %s1969_s29, %s1523_s20 }
 0x2af   : > { %p1520_p1 = pnand %p1519_p12, %p2066_p10  ;;  %p1526_p11 = scmp.lt.s32.totalorder %s1524_s1, %s1518_s11 }
 0x2b1   : > { %p1521_p6 = pneg %p1520_p1  ;;  %p1527_p2 = por %p1526_p11, %p1525_p13 }
 0x2b3   : > { %p1528_p5 = pnand %p1527_p2, %p1521_p6 }
 0x366   : > { %v775_v0 = vpop.f32.mrb[4].mxu0 }
 0x367   : > { %998 = vst.msk [vmem:[%s315_s27] sm:$0xff] %vm344_vm1, %v775_v0  ;;  %v1285_v6 = vpop.f32.mrb[5].mxu0 }
 0x36a   : > { %v848_v7 = vpop.f32.mrb[4].mxu1 }
 0x36b   : > { %999 = vst.msk [vmem:[%s315_s27 + $0x8] sm:$0xff] %vm344_vm1, %v848_v7  ;;  %v921_v8 = vpop.f32.mrb[6].mxu0  ;;  %v1290_v9 = vpop.f32.mrb[5].mxu1 }
 0x36c   : > { %1000 = vst.msk [vmem:[%s315_s27 + $0x10] sm:$0xff] %vm344_vm1, %v921_v8  ;;  %v1295_v10 = vpop.f32.mrb[7].mxu0 }
 0x36e   : > { %v994_v11 = vpop.f32.mrb[6].mxu1 }
 0x36f   : > { %1001 = vst.msk [vmem:[%s315_s27 + $0x18] sm:$0xff] %vm344_vm1, %v994_v11  ;;  %v1300_v12 = vpop.f32.mrb[7].mxu1 }
 0x370   : > { %1531 = shalt.err (!%p1528_p5)
}
 0x371   : > { %s1532_s18 = scalar_lea.hbm %s1977_s5, 512  ;;  %s1536_s6 = scalar_lea.hbm %s2033_s3, 1024 }
 0x372   : > { %p1533_p7 = scmp.ne.s32.totalorder %s1977_s5, %s1532_s18  ;;  %p1537_p0 = scmp.lt.u32.totalorder %s1977_s5, %s2033_s3 }
 0x373   : > { %p1538_p8 = scmp.lt.u32.totalorder %s1536_s6, %s1532_s18  ;;  %p1540_p12 = scmp.lt.u32.totalorder %s1532_s18, %s1977_s5 }
 0x374   : > { %p1534_p4 = pnand %p1533_p7, %p2066_p10 }
 0x375   : > { %p1539_p9 = por %p1538_p8, %p1537_p0 }
 0x376   : > { %p1535_p3 = pneg %p1534_p4 }
 0x377   : > { %p1541_p1 = por %p1540_p12, %p1539_p9 }
 0x379   : > { %p1542_p6 = pnand %p1541_p1, %p1535_p3 }
 0x37b   : > { %1545 = shalt.err (!%p1542_p6)
}
 0x37c   : > { %1307 = dma.vmem_to_hbm [thread:$0]  (%p2066_p10), %s1969_s29, 512, %s1977_s5, %s1003_s7, %s1618_s13, %s1618_s13, %s1619_s21  }
 0x37d PF: > { %s2067_s26 = sld [smem:[#allocation16_spill]]  ;;  %s1054_s22 = sand.u32 1, %s1588_s15  }
 0x37e   : > { %p2068_p13 = scmp.ne.s32.totalorder %s2054_s30, 0  ;;  %s1055_s24 = scalar_lea.sflag [#allocation4], %s1054_s22 }
 0x383   : > { %p2069_p11 = scmp.ge.s32.totalorder %s2067_s26, 2 }
 0x385   : > { %p1322_p2 = pnand %p2069_p11, %p2068_p13 }
 0x387   : > { %1579 = dma.done.wait (!%p1322_p2), %s1055_s24, 512  }
 0x388   : > { %1581 = vsyncadd (!%p1322_p2), %s1055_s24, 4294966784  ;;  %s1064_s28 = scalar_lea.sflag [#allocation10], %s1054_s22 }
 0x389   : > { %1583 = dma.done.wait (!%p1322_p2), %s1064_s28, 512  }
 0x38a   : > { %1585 = vsyncadd (!%p1322_p2), %s1064_s28, 4294966784  ;;  %s27_s20 = sadd.s32 1, %s2067_s26   ;;  %s2070_s25 = sld [smem:[#allocation18_spill]] }
 0x38b   : > { %p24_p5 = scmp.ge.s32.totalorder %s27_s20, 4   ;;  %s2071_s18 = sld [smem:[#allocation15_spill]] }
 0x38c   : > { %s2072_s19 = sld [smem:[#allocation17_spill]]  ;;  %s2073_s15 = smov %s1592_s16 }
 0x38d   : > { %s2074_s16 = smov %s1596_s17  ;;  %26 = sbr.rel (!%p24_p5) target bundleno = 12 (0xc), region = 118 }
 0x390   : > { %s2075_s17 = smov %s2070_s25 }
 0x394   :  { %1069 = vsyncpa [#allocation3], 1 }
 0x395   :  { %1071 = vsyncpa [#allocation3 + $0x1], 1 }
 0x396   :  { %1072 = vsyncpa [#allocation6], 1 }
 0x397   :  { %1074 = vsyncpa [#allocation6 + $0x1], 1 }
 0x398   :  { %1075 = vsyncpa [#allocation4], 1 }
 0x399   :  { %1077 = vsyncpa [#allocation4 + $0x1], 1 }
 0x39a   :  { %1078 = vsyncpa [#allocation10], 1 }
 0x39b   :  { %1080 = vsyncpa [#allocation10 + $0x1], 1 }

</bundles_post_ra>
